<compile_context>
chip_gen: v7x
topology: tpu7x:2x2x1
jax: 0.10.0
libtpu: 0.0.40
codegen_flags: <defaults>
</compile_context>

<pallas_src>
import functools

import jax
import jax.numpy as jnp
from jax import lax
from jax.experimental import pallas as pl
from jax.experimental.pallas import tpu as pltpu

_NUM_SPLITS = 2                    # leading "parallel" grid axis (v7x: 2 TCs)
_BLOCK_BYTES = 4 * 1024 * 1024     # per-input block target
_CHUNK_ROWS = 256                  # inner accumulation chunk (multiple of 16)
_VMEM_LIMIT = 40 * 1024 * 1024     # 2 inputs x 2 bufs x 4 MiB = 16 MiB + slack


def _partial_sumsq_kernel(pred_ref, gt_ref, out_ref, *,
                          use_target_weight, nchunks, chunk):
    """Accumulate sum(((pred-gt)*w)^2) of one (tr, 128) block into the resident
    (8, 128) f32 accumulator output (constant block index along the inner
    'arbitrary' grid axis)."""

    @pl.when(pl.program_id(1) == 0)
    def _init():
        out_ref[...] = jnp.zeros_like(out_ref)

    def body(k, carry):
        r = pl.multiple_of(k * chunk, chunk)
        p = pred_ref[pl.ds(r, chunk), :].astype(jnp.float32)
        g = gt_ref[pl.ds(r, chunk), :].astype(jnp.float32)
        d = p - g
        if use_target_weight:
            # weights = where(gt > 0.1, 1.0, 0.1); (p*w - g*w) == (p - g) * w
            d = d * jnp.where(g > 0.1, jnp.float32(1.0), jnp.float32(0.1))
        out_ref[...] += jnp.sum((d * d).reshape(-1, 8, 128), axis=0)
        return carry

    lax.fori_loop(0, nchunks, body, 0, unroll=(nchunks <= 8))


@functools.partial(jax.jit, static_argnums=(2,))
def joints_mse_loss(output, target, use_target_weight=True):
    """JAX/Pallas equivalent of JointsMSELoss.forward.

    output, target: (B, J, H, W). Returns scalar float32 loss (sum over
    joints of per-joint mean MSE; per-pixel weights derived from target)."""
    B, J, H, W = output.shape
    P = H * W
    N = B * J * P
    denom = jnp.float32(B * P)      # per-joint MSE denominator (same for all)
    itemsize = jnp.dtype(output.dtype).itemsize

    rows = pl.cdiv(N, 128)                     # lane-dense rows after flatten
    half = pl.cdiv(rows, _NUM_SPLITS)          # rows per TC split

    # Block rows: <= ~4 MiB/input, multiple of 16 (bf16 (16,128) packing) and
    # of the inner chunk; padding (below) removes any divisibility constraint.
    max_tr = max(16, (_BLOCK_BYTES // (128 * itemsize)) // 16 * 16)
    tr = min(max_tr, ((half + 15) // 16) * 16)
    chunk = min(_CHUNK_ROWS, tr)
    tr = ((tr + chunk - 1) // chunk) * chunk   # tr % chunk == 0
    nchunks = tr // chunk

    nblk = pl.cdiv(rows, _NUM_SPLITS * tr)     # blocks per split (even total)
    rows_padded = _NUM_SPLITS * nblk * tr
    n_padded = rows_padded * 128

    pred = output.reshape(-1)
    gt = target.reshape(-1)
    pad = n_padded - N
    if pad:
        pred = jnp.pad(pred, (0, pad))         # zeros -> contribute exactly 0
        gt = jnp.pad(gt, (0, pad))
    pred = pred.reshape(rows_padded, 128)
    gt = gt.reshape(rows_padded, 128)

    kernel = functools.partial(
        _partial_sumsq_kernel,
        use_target_weight=bool(use_target_weight),
        nchunks=nchunks, chunk=chunk)
    in_map = lambda c, i: (c * nblk + i, 0)

    partials = pl.pallas_call(
        kernel,
        out_shape=jax.ShapeDtypeStruct((_NUM_SPLITS * 8, 128), jnp.float32),
        grid=(_NUM_SPLITS, nblk),
        in_specs=[pl.BlockSpec((tr, 128), in_map),
                  pl.BlockSpec((tr, 128), in_map)],
        out_specs=pl.BlockSpec((8, 128), lambda c, i: (c, 0)),
        compiler_params=pltpu.CompilerParams(
            dimension_semantics=("parallel", "arbitrary"),
            vmem_limit_bytes=_VMEM_LIMIT),
        cost_estimate=pl.CostEstimate(
            flops=6 * n_padded, transcendentals=0,
            bytes_accessed=2 * n_padded * itemsize),
    )(pred, gt)

    # Tiny trailing fusion: sum 2x(8,128) partials + divide.
    return jnp.sum(partials) / denom


def joints_mse_loss_ref(output, target, use_target_weight=True):
    """Pure-JAX reference mirroring the PyTorch forward exactly."""
    B, J, _, _ = output.shape
    pred = output.reshape(B, J, -1).astype(jnp.float32)
    gt = target.reshape(B, J, -1).astype(jnp.float32)
    w = jnp.where(gt > 0.1, 1.0, 0.1)
    loss = 0.0
    for idx in range(J):
        p = pred[:, idx]
        g = gt[:, idx]
        if use_target_weight:
            wi = w[:, idx]
            loss += jnp.mean((p * wi - g * wi) ** 2)
        else:
            loss += jnp.mean((p - g) ** 2)
    return loss


if __name__ == "__main__":
    # Module config (deterministic, set in-script): use_target_weight=True.
    use_target_weight = True

    key = jax.random.PRNGKey(0)
    k1, k2 = jax.random.split(key)
    B, J, H, W = 2, 4, 16, 16
    output = jax.random.uniform(k1, (B, J, H, W), dtype=jnp.float32)
    target = jax.random.uniform(k2, (B, J, H, W), dtype=jnp.float32)

    loss = jax.block_until_ready(
        joints_mse_loss(output, target, use_target_weight))
    ref = jax.block_until_ready(
        joints_mse_loss_ref(output, target, use_target_weight))
    assert jnp.allclose(loss, ref, rtol=1e-5, atol=1e-6), (loss, ref)

    # Odd shape (exercises the zero-padding path; not a multiple of 1024).
    k3, k4 = jax.random.split(k2)
    out2 = jax.random.uniform(k3, (2, 3, 13, 17), dtype=jnp.float32)
    tgt2 = jax.random.uniform(k4, (2, 3, 13, 17), dtype=jnp.float32)
    loss2 = jax.block_until_ready(
        joints_mse_loss(out2, tgt2, use_target_weight))
    ref2 = joints_mse_loss_ref(out2, tgt2, use_target_weight)
    assert jnp.allclose(loss2, ref2, rtol=1e-5, atol=1e-6), (loss2, ref2)

    print("KERNEL_OK")
</pallas_src>

<mosaic_0001>
module attributes {stable_mosaic.version = 11 : i64} {
  func.func @_partial_sumsq_kernel(%arg0: i32, %arg1: i32, %arg2: memref<16x128xf32, #tpu.memory_space<vmem>>, %arg3: memref<16x128xf32, #tpu.memory_space<vmem>>, %arg4: memref<8x128xf32, #tpu.memory_space<vmem>>) attributes {dimension_semantics = [#tpu.dimension_semantics<parallel>, #tpu.dimension_semantics<arbitrary>], iteration_bounds = array<i64: 2, 1>, scalar_prefetch = 0 : i64, scratch_operands = 0 : i64, tpu.core_type = #tpu.core_type<tc>, window_params = [{transform_indices = @transform_0, window_bounds = array<i64: 16, 128>}, {transform_indices = @transform_1, window_bounds = array<i64: 16, 128>}, {transform_indices = @transform_2, window_bounds = array<i64: 8, 128>}]} {
    %c0_i32 = arith.constant 0 : i32
    %0 = arith.cmpi eq, %arg1, %c0_i32 : i32
    %1 = arith.extui %0 : i1 to i32
    %c0_i32_0 = arith.constant 0 : i32
    %2 = arith.cmpi ne, %1, %c0_i32_0 : i32
    scf.if %2 {
      %cst_10 = arith.constant 0.000000e+00 : f32
      %22 = vector.broadcast %cst_10 : f32 to vector<8x128xf32>
      %c0_11 = arith.constant 0 : index
      %c0_12 = arith.constant 0 : index
      %23 = vector.load %arg4[%c0_11, %c0_12] : memref<8x128xf32, #tpu.memory_space<vmem>>, vector<8x128xf32>
      tpu.vector_store %arg4[%c0_11, %c0_12], %22 {strides = array<i32>} : memref<8x128xf32, #tpu.memory_space<vmem>>, vector<8x128xf32>,
    } else {
    }
    %c0_i32_1 = arith.constant 0 : i32
    %c16_i32 = arith.constant 16 : i32
    %3 = arith.muli %c0_i32_1, %c16_i32 : i32
    %4 = tpu.assume_multiple %3, 16 : i32
    %5 = arith.index_cast %4 : i32 to index
    %c0 = arith.constant 0 : index
    %6 = vector.load %arg2[%5, %c0] : memref<16x128xf32, #tpu.memory_space<vmem>>, vector<16x128xf32>
    %7 = arith.index_cast %4 : i32 to index
    %c0_2 = arith.constant 0 : index
    %8 = vector.load %arg3[%7, %c0_2] : memref<16x128xf32, #tpu.memory_space<vmem>>, vector<16x128xf32>
    %9 = arith.subf %6, %8 : vector<16x128xf32>
    %cst = arith.constant 1.000000e-01 : f32
    %10 = vector.broadcast %cst : f32 to vector<16x128xf32>
    %11 = arith.cmpf ogt, %8, %10 : vector<16x128xf32>
    %cst_3 = arith.constant 1.000000e+00 : f32
    %cst_4 = arith.constant 1.000000e-01 : f32
    %12 = vector.broadcast %cst_3 : f32 to vector<16x128xf32>
    %13 = vector.broadcast %cst_4 : f32 to vector<16x128xf32>
    %14 = arith.select %11, %12, %13 : vector<16x128xi1>, vector<16x128xf32>
    %15 = arith.mulf %9, %14 : vector<16x128xf32>
    %c0_5 = arith.constant 0 : index
    %c0_6 = arith.constant 0 : index
    %16 = vector.load %arg4[%c0_5, %c0_6] : memref<8x128xf32, #tpu.memory_space<vmem>>, vector<8x128xf32>
    %17 = arith.mulf %15, %15 : vector<16x128xf32>
    %18 = vector.shape_cast %17 : vector<16x128xf32> to vector<2x8x128xf32>
    %cst_7 = arith.constant dense<0.000000e+00> : vector<8x128xf32>
    %19 = vector.multi_reduction <add>, %18, %cst_7 [0] : vector<2x8x128xf32> to vector<8x128xf32>
    %20 = arith.addf %16, %19 : vector<8x128xf32>
    %c0_8 = arith.constant 0 : index
    %c0_9 = arith.constant 0 : index
    %21 = vector.load %arg4[%c0_8, %c0_9] : memref<8x128xf32, #tpu.memory_space<vmem>>, vector<8x128xf32>
    tpu.vector_store %arg4[%c0_8, %c0_9], %20 {strides = array<i32>} : memref<8x128xf32, #tpu.memory_space<vmem>>, vector<8x128xf32>,
    %c1_i32 = arith.constant 1 : i32
    return
  }
  func.func @transform_0(%arg0: i32, %arg1: i32) -> (i32, i32) {
    %c1_i32 = arith.constant 1 : i32
    %0 = arith.muli %arg0, %c1_i32 : i32
    %1 = arith.addi %0, %arg1 : i32
    %c0_i32 = arith.constant 0 : i32
    %c0_i32_0 = arith.constant 0 : i32
    return %1, %c0_i32 : i32, i32
  }
  func.func @transform_1(%arg0: i32, %arg1: i32) -> (i32, i32) {
    %c1_i32 = arith.constant 1 : i32
    %0 = arith.muli %arg0, %c1_i32 : i32
    %1 = arith.addi %0, %arg1 : i32
    %c0_i32 = arith.constant 0 : i32
    %c0_i32_0 = arith.constant 0 : i32
    return %1, %c0_i32 : i32, i32
  }
  func.func @transform_2(%arg0: i32, %arg1: i32) -> (i32, i32) {
    %c0_i32 = arith.constant 0 : i32
    %c0_i32_0 = arith.constant 0 : i32
    return %arg0, %c0_i32 : i32, i32
  }
}

</mosaic_0001>

<bundles_post_ra>
// kernel: joints_mse_loss.1
= control target key start
LH: loop header
LB: loop body
LE: loop exit
PB: predicated region body
PF: predicated region fallthrough
CT: control target
= control target key end

     0   :  { %s366_s9 = smov 0   ;;  %s368_s10 = smov 0   ;;  %s402_s0 = inlined_call_operand.vmem [shape: f32[32,128], index: 0, kind: input, shape index: {}]   ;;  %s403_s1 = inlined_call_operand.vmem [shape: f32[32,128], index: 1, kind: input, shape index: {}]   ;;  %s404_s2 = inlined_call_operand.vmem [shape: f32[16,128], index: 2, kind: output, shape index: {}]  }
   0x1   :  { %s370_s11 = smov 0  }
   0x2 LB: > { %s24_s12 = sadd.s32 1, %s344_s10  ;;  %p292_p0 = scmp.ge.s32.totalorder %s348_s11, 1  ;;  %s348_s11 = sphi %s370_s11, %s12_s11   ;;  %s344_s10 = sphi %s368_s10, %s406_s10   ;;  %s340_s9 = sphi %s366_s9, %s405_s9  }
   0x3   : > { %p26_p1 = scmp.ge.s32.totalorder %s24_s12, 2  ;;  %p144_p2 = scmp.lt.s32.totalorder %s348_s11, 3 }
   0x5   : > { %s408_s12 = smov (%p26_p1, %s24_s12), 0  ;;  %p145_p3 = pnand %p292_p0, %p144_p2 }
   0x6   : > { %s293_s13 = sshll.u32 (!%p145_p3), %s340_s9, 1  ;;  %p188_p5 = scmp.lt.s32.totalorder (!%p145_p3), %s340_s9, 1  ;;  %v350_v6 = vmov (!%p145_p3), 0.1  }
   0x7   : > { %148 = sbr.rel (%p145_p3) target bundleno = 28 (0x1c), region = 28  ;;  %p174_p4 = scmp.lt.s32.totalorder (!%p145_p3), %s293_s13, 3 }
   0xe   : > { %s410_s13 = smov (!%p174_p4, %s293_s13), 3  ;;  %s412_s9 = smov (!%p188_p5, %s340_s9), 1 }
   0xf   : > { %s294_s14 = sshll.u32 %s410_s13, 3  ;;  %s297_s21 = sshll.u32 %s412_s9, 3 }
  0x10   : > { %s177_s17 = scalar_lea.vmem %s402_s0, %s294_s14  ;;  %s185_s20 = scalar_lea.vmem %s403_s1, %s294_s14 }
  0x11   : > { %v197_v0 = vld [vmem:[%s177_s17] sm:$0xff]  ;;  %v198_v1 = vld [vmem:[%s177_s17 + $0x8] sm:$0xff]  ;;  %s191_s24 = scalar_lea.vmem %s404_s2, %s297_s21 }
  0x12   : > { %v199_v2 = vld [vmem:[%s185_s20] sm:$0xff]  ;;  %v200_v3 = vld [vmem:[%s185_s20 + $0x8] sm:$0xff] }
  0x13   : > { %v201_v4 = vsub.f32 %v197_v0, %v199_v2  ;;  %vm203_vm0 = vcmp.gt.f32.partialorder %v199_v2, 0.1  ;;  %v202_v5 = vsub.f32 %v198_v1, %v200_v3  ;;  %vm204_vm1 = vcmp.gt.f32.partialorder %v200_v3, 0.1 }
  0x14   : > { %v205_v7 = vsel %vm203_vm0, 1.0, %v350_v6  ;;  %v206_v8 = vsel %vm204_vm1, 1.0, %v350_v6 }
  0x15   : > { %v207_v9 = vmul.f32 %v205_v7, %v201_v4  ;;  %v208_v10 = vmul.f32 %v206_v8, %v202_v5 }
  0x17   : > { %v210_v11 = vmul.f32 %v207_v9, %v207_v9  ;;  %v211_v12 = vmul.f32 %v208_v10, %v208_v10 }
  0x19   : > { %v212_v13 = vadd.f32 %v211_v12, %v210_v11 }
  0x1b   : > { %214 = vst [vmem:[%s191_s24] sm:$0xff] %v212_v13 }
  0x1c PF: > { %s12_s11 = sadd.s32 1, %s348_s11   ;;  %s405_s9 = smov %s344_s10 }
  0x1d   : > { %p9_p6 = scmp.ge.s32.totalorder %s12_s11, 4   ;;  %s406_s10 = smov %s408_s12 }
  0x1f   :  { %11 = sbr.rel (!%p9_p6) target bundleno = 2 (0x2), region = 65 }

</bundles_post_ra>
